<compile_context>
chip_gen: v6e
topology: v6e:2x2x1
jax: 0.10.0
libtpu: 0.0.40
codegen_flags: <defaults>
</compile_context>

<pallas_src>
import jax
import jax.numpy as jnp
from jax.experimental import pallas as pl
from jax.experimental.pallas import tpu as pltpu


def _round_up(x, m):
    return ((x + m - 1) // m) * m


def _vmem_limit_bytes():
    """3/4 of physical VMEM (96 MiB on v5e/v6e, 48 MiB on v7x)."""
    try:
        cap = int(pltpu.get_tpu_info().vmem_capacity_bytes)
    except Exception:
        cap = 64 * 1024 * 1024          # conservative fallback (v7x per-core)
    return (cap // 4) * 3


def _num_tensorcores():
    """Grid-visible TensorCores per chip (2 on v7x, 1 on v5e/v6e)."""
    try:
        kind = jax.devices()[0].device_kind.lower()
    except Exception:
        return 1
    return 2 if ("v7" in kind or "7x" in kind) else 1


def lora_kernel(x_ref, wd_ref, bd_ref, wu_ref, bu_ref, o_ref):
    # Cast x to bf16 on the VPU (the kernel is HBM-bound, VALU has slack) and
    # run the down-projection on the MXU with f32 accumulation.
    x = x_ref[...].astype(jnp.bfloat16)
    h = jnp.dot(x, wd_ref[...], preferred_element_type=jnp.float32)
    h = h + bd_ref[...]                       # f32 bias, broadcast over rows
    # TODO(synk): dropout(p=0.0002) is identity in eval mode; training-mode
    # masking would use pltpu.prng_seed / pltpu.prng_random_bits.
    # Up-projection: bf16 operands, f32 accumulation, f32 bias.
    y = jnp.dot(h.astype(jnp.bfloat16), wu_ref[...],
                preferred_element_type=jnp.float32)
    y = y + bu_ref[...]
    o_ref[...] = y.astype(o_ref.dtype)


def _pick_tm(tm_max, m_rows, d_in, h, d_out, out_bytes, vmem_budget_bytes,
             num_cores):
    """Largest row tile (multiple of 8, <= m_rows) that fits the VMEM budget.
    On multi-TensorCore chips (v7x) also keep >= 4 tiles per core so the
    parallel grid axis splits evenly across cores."""
    if m_rows < 8:
        return max(m_rows, 1)           # full-extent block, single grid step
    tm = max(8, min(_round_up(tm_max, 8), (m_rows // 8) * 8))

    def footprint(t):
        x_tile = 2 * t * d_in * 4                     # f32 x, double-buffered
        o_tile = 2 * t * d_out * out_bytes            # output, double-buffered
        w = 2 * (d_in * h + h * d_out) * 2            # bf16 resident weights
        b = 2 * (h + d_out) * 4                       # f32 resident biases
        tmp = t * (2 * d_in + 8 * h + 8 * d_out)      # in-kernel temporaries
        return x_tile + o_tile + w + b + tmp

    while tm > 8 and footprint(tm) > vmem_budget_bytes:
        tm = max(8, (tm // 2 // 8) * 8)

    if num_cores > 1:
        # v7x only: keep >= 4 tiles per core (even split) when there is
        # enough work; single-TC chips keep the biggest tile.
        while (tm > 8 and pl.cdiv(m_rows, tm) < 4 * num_cores
               and m_rows >= 8 * 4 * num_cores):
            tm = max(8, (tm // 2 // 8) * 8)
    return tm


def lora_forward(x, w_down, b_down, w_up, b_up, *, tm=1024,
                 out_dtype=jnp.float32):
    """y = (x @ w_down + b_down) @ w_up + b_up   (eval-mode dropout = identity)

    x:      [B, S, D_in]   (cast to bf16 on the VPU inside the kernel)
    w_down: [D_in, H]      (nn.Linear weight pre-transposed to in x out)
    b_down: [H]
    w_up:   [H, D_out]
    b_up:   [D_out]
    """
    B, S, D_in = x.shape
    H = w_down.shape[1]
    D_out = w_up.shape[1]
    M = B * S

    vmem_limit = _vmem_limit_bytes()
    vmem_budget = vmem_limit - 4 * 1024 * 1024     # margin for Mosaic scratch
    num_cores = _num_tensorcores()
    out_bytes = jnp.dtype(out_dtype).itemsize

    tm_eff = _pick_tm(tm, M, D_in, H, D_out, out_bytes, vmem_budget, num_cores)
    grid = (pl.cdiv(M, tm_eff),)

    # Free reshape (no copy pass); weights/biases are tiny vs. the x / output
    # streams, so casting them in the wrapper is negligible. They stay
    # VMEM-resident across the whole grid via constant index_maps.
    x2d = x.reshape(M, D_in)
    wd = w_down.astype(jnp.bfloat16)               # [D_in, H]
    wu = w_up.astype(jnp.bfloat16)                 # [H, D_out]
    bd = b_down.astype(jnp.float32).reshape(1, H)
    bu = b_up.astype(jnp.float32).reshape(1, D_out)

    grid_spec = pltpu.PrefetchScalarGridSpec(
        num_scalar_prefetch=0,
        grid=grid,
        in_specs=[
            pl.BlockSpec((tm_eff, D_in), lambda i: (i, 0)),       # x row tile
            pl.BlockSpec((D_in, H), lambda i: (0, 0)),            # W_down
            pl.BlockSpec((1, H), lambda i: (0, 0)),               # b_down
            pl.BlockSpec((H, D_out), lambda i: (0, 0)),           # W_up
            pl.BlockSpec((1, D_out), lambda i: (0, 0)),           # b_up
        ],
        out_specs=pl.BlockSpec((tm_eff, D_out), lambda i: (i, 0)),
    )

    out2d = pl.pallas_call(
        lora_kernel,
        out_shape=jax.ShapeDtypeStruct((M, D_out), out_dtype),
        grid_spec=grid_spec,
        compiler_params=pltpu.CompilerParams(
            dimension_semantics=("parallel",),
            vmem_limit_bytes=vmem_limit),
    )(x2d, wd, bd, wu, bu)

    return out2d.reshape(B, S, D_out)


if __name__ == "__main__":
    # Small shapes consistent with the module (LoRA rank = hidden_dim = 32).
    B, S = 2, 8
    input_size, output_size, hidden_dim = 128, 128, 32

    key = jax.random.PRNGKey(0)
    kx, kwd, kbd, kbu, kwu = jax.random.split(key, 5)

    x = jax.random.normal(kx, (B, S, input_size), dtype=jnp.float32)

    # Module init: ff_down.weight ~ U[0,1), ff_up.weight = zeros; biases use
    # PyTorch's default Linear init U(-1/sqrt(fan_in), 1/sqrt(fan_in)).
    w_down_t = jax.random.uniform(kwd, (hidden_dim, input_size),
                                  dtype=jnp.float32)
    b_down = jax.random.uniform(kbd, (hidden_dim,), jnp.float32,
                                -1.0 / input_size ** 0.5,
                                1.0 / input_size ** 0.5)
    b_up = jax.random.uniform(kbu, (output_size,), jnp.float32,
                              -1.0 / hidden_dim ** 0.5,
                              1.0 / hidden_dim ** 0.5)

    # Kernel takes weights pre-transposed to [in_features, out_features].
    w_down = w_down_t.T                                    # [D_in, H]
    w_up_zero = jnp.zeros((hidden_dim, output_size), jnp.float32)  # module init

    def ref_f32(x, wd, bdn, wu, bup):
        # Pure f32 reference matching the PyTorch module (eval-mode dropout
        # is identity). The kernel uses bf16 matmul operands with f32
        # accumulation, so the second check uses a modest tolerance.
        h = x.reshape(-1, x.shape[-1]) @ wd + bdn
        y = h @ wu + bup
        return y.reshape(x.shape[0], x.shape[1], -1)

    # 1) Module-faithful init: ff_up weight is all zeros -> y == b_up exactly
    #    (the bf16 path multiplies by zero, biases stay f32 end-to-end).
    y = jax.block_until_ready(lora_forward(x, w_down, b_down, w_up_zero, b_up))
    assert y.shape == (B, S, output_size)
    assert y.dtype == jnp.float32
    assert jnp.allclose(y, ref_f32(x, w_down, b_down, w_up_zero, b_up),
                        atol=1e-6, rtol=1e-6)

    # 2) Non-trivial ff_up weights exercise the full matmul chain; tolerance
    #    accounts for bf16 operand rounding vs. the f32 reference.
    w_up = 0.1 * jax.random.normal(kwu, (hidden_dim, output_size), jnp.float32)
    y2 = jax.block_until_ready(lora_forward(x, w_down, b_down, w_up, b_up))
    assert jnp.allclose(y2, ref_f32(x, w_down, b_down, w_up, b_up),
                        atol=1e-1, rtol=5e-2)

    print("KERNEL_OK")
</pallas_src>

<mosaic_0001>
module attributes {stable_mosaic.version = 11 : i64} {
  func.func @lora_kernel(%arg0: i32, %arg1: memref<16x128xf32, #tpu.memory_space<vmem>>, %arg2: memref<128x32xbf16, #tpu.memory_space<vmem>>, %arg3: memref<1x32xf32, #tpu.memory_space<vmem>>, %arg4: memref<32x128xbf16, #tpu.memory_space<vmem>>, %arg5: memref<1x128xf32, #tpu.memory_space<vmem>>, %arg6: memref<16x128xf32, #tpu.memory_space<vmem>>) attributes {dimension_semantics = [#tpu.dimension_semantics<parallel>], iteration_bounds = array<i64: 1>, scalar_prefetch = 0 : i64, scratch_operands = 0 : i64, tpu.core_type = #tpu.core_type<tc>, window_params = [{transform_indices = @transform_0, window_bounds = array<i64: 16, 128>}, {pipeline_mode = #tpu.pipeline_mode<synchronous>, transform_indices = @transform_1, window_bounds = array<i64: 128, 32>}, {pipeline_mode = #tpu.pipeline_mode<synchronous>, transform_indices = @transform_2, window_bounds = array<i64: 1, 32>}, {pipeline_mode = #tpu.pipeline_mode<synchronous>, transform_indices = @transform_3, window_bounds = array<i64: 32, 128>}, {pipeline_mode = #tpu.pipeline_mode<synchronous>, transform_indices = @transform_4, window_bounds = array<i64: 1, 128>}, {transform_indices = @transform_5, window_bounds = array<i64: 16, 128>}]} {
    %c0 = arith.constant 0 : index
    %c0_0 = arith.constant 0 : index
    %0 = vector.load %arg1[%c0, %c0_0] : memref<16x128xf32, #tpu.memory_space<vmem>>, vector<16x128xf32>
    %1 = arith.truncf %0 : vector<16x128xf32> to vector<16x128xbf16>
    %c0_1 = arith.constant 0 : index
    %c0_2 = arith.constant 0 : index
    %2 = vector.load %arg2[%c0_1, %c0_2] : memref<128x32xbf16, #tpu.memory_space<vmem>>, vector<128x32xbf16>
    %cst = arith.constant dense<0.000000e+00> : vector<16x32xf32>
    %3 = tpu.matmul %1, %2, %cst {dimension_numbers = #tpu.dot_dimension_numbers<[1], [0], [0], [1], [0, 0, 1, 1], [], []>} : vector<16x128xbf16>, vector<128x32xbf16>, vector<16x32xf32> -> vector<16x32xf32>
    %c0_3 = arith.constant 0 : index
    %c0_4 = arith.constant 0 : index
    %4 = vector.load %arg3[%c0_3, %c0_4] : memref<1x32xf32, #tpu.memory_space<vmem>>, vector<1x32xf32>
    %5 = vector.broadcast %4 : vector<1x32xf32> to vector<16x32xf32>
    %6 = arith.addf %3, %5 : vector<16x32xf32>
    %7 = arith.truncf %6 : vector<16x32xf32> to vector<16x32xbf16>
    %c0_5 = arith.constant 0 : index
    %c0_6 = arith.constant 0 : index
    %8 = vector.load %arg4[%c0_5, %c0_6] : memref<32x128xbf16, #tpu.memory_space<vmem>>, vector<32x128xbf16>
    %cst_7 = arith.constant dense<0.000000e+00> : vector<16x128xf32>
    %9 = tpu.matmul %7, %8, %cst_7 {dimension_numbers = #tpu.dot_dimension_numbers<[1], [0], [0], [1], [0, 0, 1, 1], [], []>} : vector<16x32xbf16>, vector<32x128xbf16>, vector<16x128xf32> -> vector<16x128xf32>
    %c0_8 = arith.constant 0 : index
    %c0_9 = arith.constant 0 : index
    %10 = vector.load %arg5[%c0_8, %c0_9] : memref<1x128xf32, #tpu.memory_space<vmem>>, vector<1x128xf32>
    %11 = vector.broadcast %10 : vector<1x128xf32> to vector<16x128xf32>
    %12 = arith.addf %9, %11 : vector<16x128xf32>
    %c0_10 = arith.constant 0 : index
    %c0_11 = arith.constant 0 : index
    %13 = vector.load %arg6[%c0_10, %c0_11] : memref<16x128xf32, #tpu.memory_space<vmem>>, vector<16x128xf32>
    tpu.vector_store %arg6[%c0_10, %c0_11], %12 {strides = array<i32>} : memref<16x128xf32, #tpu.memory_space<vmem>>, vector<16x128xf32>,
    return
  }
  func.func @transform_0(%arg0: i32) -> (i32, i32) {
    %c0_i32 = arith.constant 0 : i32
    %c0_i32_0 = arith.constant 0 : i32
    return %arg0, %c0_i32 : i32, i32
  }
  func.func @transform_1(%arg0: i32) -> (i32, i32) {
    %c0_i32 = arith.constant 0 : i32
    %c0_i32_0 = arith.constant 0 : i32
    %c0_i32_1 = arith.constant 0 : i32
    return %c0_i32, %c0_i32_0 : i32, i32
  }
  func.func @transform_2(%arg0: i32) -> (i32, i32) {
    %c0_i32 = arith.constant 0 : i32
    %c0_i32_0 = arith.constant 0 : i32
    %c0_i32_1 = arith.constant 0 : i32
    return %c0_i32, %c0_i32_0 : i32, i32
  }
  func.func @transform_3(%arg0: i32) -> (i32, i32) {
    %c0_i32 = arith.constant 0 : i32
    %c0_i32_0 = arith.constant 0 : i32
    %c0_i32_1 = arith.constant 0 : i32
    return %c0_i32, %c0_i32_0 : i32, i32
  }
  func.func @transform_4(%arg0: i32) -> (i32, i32) {
    %c0_i32 = arith.constant 0 : i32
    %c0_i32_0 = arith.constant 0 : i32
    %c0_i32_1 = arith.constant 0 : i32
    return %c0_i32, %c0_i32_0 : i32, i32
  }
  func.func @transform_5(%arg0: i32) -> (i32, i32) {
    %c0_i32 = arith.constant 0 : i32
    %c0_i32_0 = arith.constant 0 : i32
    return %arg0, %c0_i32 : i32, i32
  }
}

</mosaic_0001>

<bundles_post_ra>
// kernel: tpu_custom_call.1
= control target key start
LH: loop header
LB: loop body
LE: loop exit
PB: predicated region body
PF: predicated region fallthrough
CT: control target
= control target key end

     0   :  { %v314_v1 = vmov 0.0   ;;  %vm315_vm0 = vmmov 0   ;;  %s394_s0 = inlined_call_operand.vmem [shape: f32[16,128], index: 0, kind: input, shape index: {}]   ;;  %s395_s1 = inlined_call_operand.vmem [shape: bf16[128,32], index: 1, kind: input, shape index: {}]   ;;  %s396_s2 = inlined_call_operand.vmem [shape: f32[1,32], index: 2, kind: input, shape index: {}]   ;;  %s397_s3 = inlined_call_operand.vmem [shape: bf16[32,128], index: 3, kind: input, shape index: {}]   ;;  %s398_s4 = inlined_call_operand.vmem [shape: f32[1,128], index: 4, kind: input, shape index: {}]   ;;  %s399_s5 = inlined_call_operand.hbm [shape: f32[16,128], index: 5, kind: output, shape index: {}]  }
   0x1   :  { %v282_v0 = vld [vmem:[%s395_s1 + $0x38] sm:$0xff]   ;;  %249 = vmatprep.subr.bf16.mxu0 %v314_v1  ;;  %269 = vmatprep.subr.bf16.mxu1 %v314_v1  ;;  %v283_v2 = vld [vmem:[%s395_s1 + $0x30] sm:$0xff]   ;;  %v284_v3 = vld [vmem:[%s395_s1 + $0x28] sm:$0xff]  }
   0x2   :  { %250 = vmatpush3.bf16.msra.mxu0 %v282_v0  ;;  %265 = vmatprep.mubr.msk.bf16.mxu0 %vm315_vm0, %v314_v1  ;;  %v285_v4 = vld [vmem:[%s395_s1 + $0x20] sm:$0xff]  }
   0x3   :  { %251 = vmatprep.subr.bf16.mxu0 %v314_v1  ;;  %273 = vmatprep.mubr.msk.bf16.mxu1 %vm315_vm0, %v314_v1 }
   0x6   :  { %252 = vmatpush3.bf16.msra.mxu0 %v283_v2 }
   0x7   :  { %253 = vmatprep.subr.bf16.mxu0 %v314_v1 }
   0xa   :  { %254 = vmatpush3.bf16.msra.mxu0 %v284_v3 }
   0xb   :  { %10 = vsyncpa [#allocation3], 0  ;;  %255 = vmatprep.subr.bf16.mxu0 %v314_v1  ;;  %v286_v5 = vld [vmem:[%s395_s1 + $0x18] sm:$0xff]   ;;  %v287_v6 = vld [vmem:[%s395_s1 + $0x10] sm:$0xff]   ;;  %vm161_vm1 = vcmask 261120  }
   0xc   :  { %v288_v7 = vld [vmem:[%s395_s1 + $0x8] sm:$0xff]   ;;  %v289_v8 = vld [vmem:[%s395_s1] sm:$0xff]  }
   0xd   :  { %v22_v9 = vld [vmem:[%s394_s0] sm:$0xff]  ;;  %v23_v10 = vld [vmem:[%s394_s0 + $0x8] sm:$0xff] }
   0xe   :  { %256 = vmatpush3.bf16.msra.mxu0 %v285_v4  ;;  %v24_v11 = vpack.c.bf16 %v23_v10, %v22_v9  ;;  %v290_v12 = vld [vmem:[%s397_s3 + $0x8] sm:$0xff]   ;;  %v291_v13 = vld [vmem:[%s397_s3] sm:$0xff]   ;;  %s316_s3 = smov [#allocation2]  }
   0xf   :  { %257 = vmatprep.subr.bf16.mxu0 %v314_v1  ;;  %270 = vmatpush3.bf16.msra.mxu1 %v290_v12  ;;  %v224_v15 = vld [vmem:[%s396_s2] ss:$0 sm:$0xff]  ;;  %s213_s19 = sshll.u32 %s316_s3, 4  ;;  %s214_s19 = int_to_ptr.vmem [resolvable:$true] %s213_s19 }
  0x10   :  { %271 = vmatprep.subr.bf16.mxu1 %v314_v1  ;;  %v233_v22 = vld [vmem:[%s398_s4] ss:$0 sm:$0xff]  ;;  %s292_s2 = scalar_lea.vmem %s214_s19, 256  ;;  %p297_p1 = scmp.lt.s32.totalorder %s214_s19, %s214_s19 }
  0x11   :  { %p293_p0 = scmp.ne.s32.totalorder %s214_s19, %s292_s2  ;;  %p298_p2 = scmp.lt.s32.totalorder %s292_s2, %s292_s2 }
  0x12   :  { %258 = vmatpush3.bf16.msra.mxu0 %v286_v5 }
  0x13   :  { %259 = vmatprep.subr.bf16.mxu0 %v314_v1  ;;  %272 = vmatpush3.bf16.msra.mxu1 %v291_v13  ;;  %p299_p3 = por %p298_p2, %p297_p1 }
  0x15   :  { %p300_p4 = pnand %p299_p3, %p293_p0 }
  0x16   :  { %260 = vmatpush3.bf16.msra.mxu0 %v287_v6 }
  0x17   :  { %261 = vmatprep.subr.bf16.mxu0 %v314_v1 }
  0x1a   :  { %262 = vmatpush3.bf16.msra.mxu0 %v288_v7 }
  0x1b   :  { %263 = vmatprep.subr.bf16.mxu0 %v314_v1 }
  0x1e   :  { %264 = vmatpush3.bf16.msra.mxu0 %v289_v8 }
  0x21   :  { %266 = vmatmul.mubr.bf16.vlgmr.msra.gmra.mxu0 %v24_v11 }
  0xe1   :  { %v130_v14 = vpop.f32.mrf.mxu0 }
  0xe2   :  { %v131_v18 = vadd.f32 %v224_v15, %v130_v14 }
  0xe3   :  { %v267_v16 = vpop.f32.mrf.mxu0 }
  0xe5   :  { %v133_v17 = vpop.f32.mrf.mxu0 }
  0xe6   :  { %v134_v19 = vadd.f32 %v224_v15, %v133_v17 }
  0xe7   :  { %v268_v20 = vpop.f32.mrf.mxu0 }
  0xe8   :  { %v137_v21 = vpack.c.bf16 %v134_v19, %v131_v18 }
  0xea   :  { %274 = vmatmul.mubr.msk.bf16.vlgmr.msra.gmra.mxu1 %vm161_vm1, %v137_v21 }
 0x1aa   :  { %v199_v23 = vpop.f32.mrf.mxu1 }
 0x1ab   :  { %v200_v24 = vadd.f32 %v233_v22, %v199_v23 }
 0x1ac   :  { %v275_v25 = vpop.f32.mrf.mxu1 }
 0x1ad   :  { %206 = vst [vmem:[#allocation2] sm:$0xff] %v200_v24 }
 0x1ae   :  { %v202_v26 = vpop.f32.mrf.mxu1 }
 0x1af   :  { %v203_v27 = vadd.f32 %v233_v22, %v202_v26 }
 0x1b0   :  { %v276_v28 = vpop.f32.mrf.mxu1 }
 0x1b1   :  { %207 = vst [vmem:[#allocation2 + $0x8] sm:$0xff] %v203_v27 }
 0x1b2   :  { %303 = shalt.err (!%p300_p4)
}
 0x1b3   :  { %s317_s20 = smov 128   ;;  %s318_s4 = smov 8  }
 0x1b4   :  { %219 = dma.vmem_to_hbm [thread:$0]  %s214_s19, 256, %s399_s5, [#allocation3], %s317_s20, %s317_s20, %s318_s4  }
 0x1b5   :  { %312 = dma.done.wait [#allocation3], 256  }
 0x1b6   :  { %313 = vsyncadd [#allocation3], 4294967040 }
 0x1b7   :  { %223 = vsyncpa [#allocation3], 1 }

</bundles_post_ra>
